<compile_context>
chip_gen: v7x
topology: tpu7x:2x2x1
jax: 0.10.0
libtpu: 0.0.40
codegen_flags: <defaults>
</compile_context>

<pallas_src>
import jax
import jax.numpy as jnp
from jax.experimental import pallas as pl
from jax.experimental.pallas import tpu as pltpu

LANE = 128
SUBLANE = 8


def _round_up(n, m):
    return ((n + m - 1) // m) * m


# ----------------------------- fused Pallas kernel -----------------------------

def _make_fused_mlp_kernel(n_layers):
    """Kernel refs: x (Bp,Dp) bf16, w_stack (L+1,Dp,Dp) bf16,
    b_stack (L+1,1,Dp) f32, out (Bp,Dp) f32."""

    def kernel(x_ref, w_ref, b_ref, out_ref):
        h = x_ref[...]                                   # (Bp, Dp) bf16, stays in vregs
        for i in range(n_layers):                        # static unroll at trace time
            z = jnp.dot(h, w_ref[i], preferred_element_type=jnp.float32) + b_ref[i]
            h = jnp.maximum(z, 0.0).astype(jnp.bfloat16) # ReLU; BN scale/shift pre-folded
        out_ref[...] = (
            jnp.dot(h, w_ref[n_layers], preferred_element_type=jnp.float32)
            + b_ref[n_layers]
        )

    return kernel


def _nnmodel_forward(padded_params, x):
    """Fused forward. x: (B, F) f32. Returns (B, 1) f32."""
    w_stack, b_stack = padded_params                     # (L+1,Dp,Dp) bf16, (L+1,1,Dp) f32
    n_layers = w_stack.shape[0] - 1
    Dp = w_stack.shape[1]

    B, F = x.shape
    Bp = _round_up(B, SUBLANE)
    x_p = jnp.pad(x, ((0, Bp - B), (0, Dp - F))).astype(jnp.bfloat16)

    vmem = pl.BlockSpec(memory_space=pltpu.MemorySpace.VMEM)
    out = pl.pallas_call(
        _make_fused_mlp_kernel(n_layers),
        out_shape=jax.ShapeDtypeStruct((Bp, Dp), jnp.float32),  # lane-dense output
        in_specs=[vmem, vmem, vmem],
        out_specs=vmem,
    )(x_p, w_stack, b_stack)
    return out[:B, :1]


# Pad, pallas_call and final slice all under one jit => single dispatch.
nnmodel_forward = jax.jit(_nnmodel_forward)


# ------------------------------ parameter handling ------------------------------

def init_params(key, input_shape, n_layers, neurons):
    """Logical (unpadded) parameters matching the PyTorch module's shapes."""
    eps = 1e-5
    dims = [input_shape] + list(neurons)
    layers = []
    for i in range(n_layers):
        fan_in, fan_out = dims[i], dims[i + 1]
        key, kw, kb = jax.random.split(key, 3)
        bound = 1.0 / jnp.sqrt(fan_in)
        w = jax.random.uniform(kw, (fan_in, fan_out), jnp.float32, -bound, bound)
        b = jax.random.uniform(kb, (fan_out,), jnp.float32, -bound, bound)
        # BatchNorm1d defaults: gamma=1, beta=0, running_mean=0, running_var=1
        gamma = jnp.ones((fan_out,), jnp.float32)
        beta = jnp.zeros((fan_out,), jnp.float32)
        running_mean = jnp.zeros((fan_out,), jnp.float32)
        running_var = jnp.ones((fan_out,), jnp.float32)
        scale = gamma / jnp.sqrt(running_var + eps)      # strictly positive for defaults
        shift = beta - running_mean * scale
        layers.append((w, b, scale, shift))

    fan_in = dims[-1]
    key, kw, kb = jax.random.split(key, 3)
    bound = 1.0 / jnp.sqrt(fan_in)
    w_out = jax.random.uniform(kw, (fan_in, 1), jnp.float32, -bound, bound)
    b_out = jax.random.uniform(kb, (1,), jnp.float32, -bound, bound)
    return {"layers": layers, "output": (w_out, b_out)}


def prepare_padded_params(params):
    """Fold BN scale into W/b, fold BN shift into the downstream bias, pad every
    feature dim to a common multiple of 128 lanes, stack into two arrays."""
    layers = params["layers"]
    w_out, b_out = params["output"]

    # Fold BN scale through ReLU: relu(x@(W*s)+b*s) == relu(x@W+b)*s, valid iff s > 0.
    for (_, _, scale, _) in layers:
        assert bool(jnp.all(scale > 0)), "BN fold requires strictly positive scale"

    folded_w, folded_b = [], []
    for (w, b, scale, _) in layers:
        folded_w.append(w * scale[None, :])
        folded_b.append(b * scale)

    # Fold each layer's shift into the NEXT layer's (already scale-folded) bias.
    for i in range(len(layers) - 1):
        shift = layers[i][3]
        folded_b[i + 1] = folded_b[i + 1] + shift @ folded_w[i + 1]
    last_shift = layers[-1][3]
    w_out_f = jnp.asarray(w_out)
    b_out_f = jnp.asarray(b_out) + last_shift @ w_out_f

    folded_w.append(w_out_f)
    folded_b.append(b_out_f)

    # Common padded width for all layers (input, hiddens, output).
    all_dims = [folded_w[0].shape[0]] + [w.shape[1] for w in folded_w]
    Dp = _round_up(max(all_dims), LANE)

    w_pads, b_pads = [], []
    for w, b in zip(folded_w, folded_b):
        fi, fo = w.shape
        w_pads.append(jnp.pad(w, ((0, Dp - fi), (0, Dp - fo))))
        b_pads.append(jnp.pad(b, (0, Dp - fo))[None, :])

    w_stack = jnp.stack(w_pads).astype(jnp.bfloat16)     # (L+1, Dp, Dp) bf16
    b_stack = jnp.stack(b_pads).astype(jnp.float32)      # (L+1, 1, Dp)  f32
    return w_stack, b_stack


def nnmodel_forward_ref(params, x):
    """Pure-JAX f32 reference (unpadded, unfused) matching module semantics."""
    for (w, b, scale, shift) in params["layers"]:
        x = jnp.maximum(x @ w + b[None, :], 0.0) * scale[None, :] + shift[None, :]
    w_out, b_out = params["output"]
    return x @ w_out + b_out[None, :]


def nnmodel_forward_folded_ref(padded_params, x):
    """Pure-JAX reference of the exact folded/padded bf16 computation (kernel check)."""
    w_stack, b_stack = padded_params
    n_layers = w_stack.shape[0] - 1
    Dp = w_stack.shape[1]
    B, F = x.shape
    h = jnp.pad(x, ((0, 0), (0, Dp - F))).astype(jnp.bfloat16)
    for i in range(n_layers):
        z = jnp.dot(h, w_stack[i], preferred_element_type=jnp.float32) + b_stack[i]
        h = jnp.maximum(z, 0.0).astype(jnp.bfloat16)
    out = jnp.dot(h, w_stack[n_layers], preferred_element_type=jnp.float32) + b_stack[n_layers]
    return out[:, :1]


# ----------------------------------- main -----------------------------------

if __name__ == "__main__":
    key = jax.random.PRNGKey(0)
    batch = 8
    input_shape = 16          # feature dim of the tabular dataset
    n_layers = 2
    neurons = [32, 32]

    key, kx, kp = jax.random.split(key, 3)
    x = jax.random.normal(kx, (batch, input_shape), jnp.float32)
    params = init_params(kp, input_shape, n_layers, neurons)
    padded_params = prepare_padded_params(params)

    out = nnmodel_forward(padded_params, x)
    out = jax.block_until_ready(out)
    assert out.shape == (batch, 1)

    # Exact check against the folded bf16 computation (validates the kernel).
    folded_ref = nnmodel_forward_folded_ref(padded_params, x)
    assert jnp.allclose(out, folded_ref, atol=1e-4, rtol=1e-4)

    # Loose check against the original f32 module semantics (bf16 weight rounding).
    ref = nnmodel_forward_ref(params, x)
    assert jnp.allclose(out, ref, atol=3e-2, rtol=3e-2)

    print("KERNEL_OK")
</pallas_src>

<mosaic_0001>
module attributes {stable_mosaic.version = 11 : i64} {
  func.func @kernel(%arg0: memref<8x128xbf16, #tpu.memory_space<vmem>>, %arg1: memref<3x128x128xbf16, #tpu.memory_space<vmem>>, %arg2: memref<3x1x128xf32, #tpu.memory_space<vmem>>, %arg3: memref<8x128xf32, #tpu.memory_space<vmem>>) attributes {dimension_semantics = [], scalar_prefetch = 0 : i64, scratch_operands = 0 : i64, tpu.core_type = #tpu.core_type<tc>} {
    %c0 = arith.constant 0 : index
    %c0_0 = arith.constant 0 : index
    %0 = vector.load %arg0[%c0, %c0_0] : memref<8x128xbf16, #tpu.memory_space<vmem>>, vector<8x128xbf16>
    %c0_1 = arith.constant 0 : index
    %c0_2 = arith.constant 0 : index
    %c0_3 = arith.constant 0 : index
    %1 = vector.load %arg1[%c0_1, %c0_2, %c0_3] : memref<3x128x128xbf16, #tpu.memory_space<vmem>>, vector<1x128x128xbf16>
    %2 = vector.shape_cast %1 : vector<1x128x128xbf16> to vector<128x128xbf16>
    %cst = arith.constant dense<0.000000e+00> : vector<8x128xf32>
    %3 = tpu.matmul %0, %2, %cst {dimension_numbers = #tpu.dot_dimension_numbers<[1], [0], [0], [1], [0, 0, 1, 1], [], []>} : vector<8x128xbf16>, vector<128x128xbf16>, vector<8x128xf32> -> vector<8x128xf32>
    %c0_4 = arith.constant 0 : index
    %c0_5 = arith.constant 0 : index
    %c0_6 = arith.constant 0 : index
    %4 = vector.load %arg2[%c0_4, %c0_5, %c0_6] : memref<3x1x128xf32, #tpu.memory_space<vmem>>, vector<1x1x128xf32>
    %5 = vector.shape_cast %4 : vector<1x1x128xf32> to vector<1x128xf32>
    %6 = vector.broadcast %5 : vector<1x128xf32> to vector<8x128xf32>
    %7 = arith.addf %3, %6 : vector<8x128xf32>
    %cst_7 = arith.constant 0.000000e+00 : f32
    %8 = vector.broadcast %cst_7 : f32 to vector<8x128xf32>
    %9 = arith.maximumf %7, %8 : vector<8x128xf32>
    %10 = arith.truncf %9 : vector<8x128xf32> to vector<8x128xbf16>
    %c1 = arith.constant 1 : index
    %c0_8 = arith.constant 0 : index
    %c0_9 = arith.constant 0 : index
    %11 = vector.load %arg1[%c1, %c0_8, %c0_9] : memref<3x128x128xbf16, #tpu.memory_space<vmem>>, vector<1x128x128xbf16>
    %12 = vector.shape_cast %11 : vector<1x128x128xbf16> to vector<128x128xbf16>
    %cst_10 = arith.constant dense<0.000000e+00> : vector<8x128xf32>
    %13 = tpu.matmul %10, %12, %cst_10 {dimension_numbers = #tpu.dot_dimension_numbers<[1], [0], [0], [1], [0, 0, 1, 1], [], []>} : vector<8x128xbf16>, vector<128x128xbf16>, vector<8x128xf32> -> vector<8x128xf32>
    %c1_11 = arith.constant 1 : index
    %c0_12 = arith.constant 0 : index
    %c0_13 = arith.constant 0 : index
    %14 = vector.load %arg2[%c1_11, %c0_12, %c0_13] : memref<3x1x128xf32, #tpu.memory_space<vmem>>, vector<1x1x128xf32>
    %15 = vector.shape_cast %14 : vector<1x1x128xf32> to vector<1x128xf32>
    %16 = vector.broadcast %15 : vector<1x128xf32> to vector<8x128xf32>
    %17 = arith.addf %13, %16 : vector<8x128xf32>
    %cst_14 = arith.constant 0.000000e+00 : f32
    %18 = vector.broadcast %cst_14 : f32 to vector<8x128xf32>
    %19 = arith.maximumf %17, %18 : vector<8x128xf32>
    %20 = arith.truncf %19 : vector<8x128xf32> to vector<8x128xbf16>
    %c2 = arith.constant 2 : index
    %c0_15 = arith.constant 0 : index
    %c0_16 = arith.constant 0 : index
    %21 = vector.load %arg1[%c2, %c0_15, %c0_16] : memref<3x128x128xbf16, #tpu.memory_space<vmem>>, vector<1x128x128xbf16>
    %22 = vector.shape_cast %21 : vector<1x128x128xbf16> to vector<128x128xbf16>
    %cst_17 = arith.constant dense<0.000000e+00> : vector<8x128xf32>
    %23 = tpu.matmul %20, %22, %cst_17 {dimension_numbers = #tpu.dot_dimension_numbers<[1], [0], [0], [1], [0, 0, 1, 1], [], []>} : vector<8x128xbf16>, vector<128x128xbf16>, vector<8x128xf32> -> vector<8x128xf32>
    %c2_18 = arith.constant 2 : index
    %c0_19 = arith.constant 0 : index
    %c0_20 = arith.constant 0 : index
    %24 = vector.load %arg2[%c2_18, %c0_19, %c0_20] : memref<3x1x128xf32, #tpu.memory_space<vmem>>, vector<1x1x128xf32>
    %25 = vector.shape_cast %24 : vector<1x1x128xf32> to vector<1x128xf32>
    %26 = vector.broadcast %25 : vector<1x128xf32> to vector<8x128xf32>
    %27 = arith.addf %23, %26 : vector<8x128xf32>
    %c0_21 = arith.constant 0 : index
    %c0_22 = arith.constant 0 : index
    %28 = vector.load %arg3[%c0_21, %c0_22] : memref<8x128xf32, #tpu.memory_space<vmem>>, vector<8x128xf32>
    tpu.vector_store %arg3[%c0_21, %c0_22], %27 {strides = array<i32>} : memref<8x128xf32, #tpu.memory_space<vmem>>, vector<8x128xf32>,
    return
  }
}

</mosaic_0001>

<bundles_post_ra>
// kernel: _nnmodel_forward.1
= control target key start
LH: loop header
LB: loop body
LE: loop exit
PB: predicated region body
PF: predicated region fallthrough
CT: control target
= control target key end

     0   :  { %8 = vsyncpa [#allocation3], 0  ;;  %s546_s12 = smov [#allocation2]   ;;  %s628_s0 = inlined_call_operand.vmem [shape: bf16[8,128], index: 0, kind: input, shape index: {}]   ;;  %s629_s1 = inlined_call_operand.hbm [shape: bf16[3,128,128], index: 1, kind: input, shape index: {}]   ;;  %s630_s2 = inlined_call_operand.vmem [shape: f32[3,1,128], index: 2, kind: input, shape index: {}]   ;;  %s631_s3 = inlined_call_operand.vmem [shape: f32[8,128], index: 3, kind: output, shape index: {}]  }
   0x1   :  { %s16_s13 = sshll.u32 %s546_s12, 4  ;;  %s522_s16 = scalar_lea.hbm %s629_s1, 3072  ;;  %s17_s13 = int_to_ptr.vmem [resolvable:$true] %s16_s13 }
   0x2   :  { %p523_p0 = scmp.ne.s32.totalorder %s629_s1, %s522_s16  ;;  %p526_p1 = scmp.lt.u32.totalorder %s522_s16, %s629_s1 }
   0x4   :  { %p528_p2 = pnand %p526_p1, %p523_p0 }
   0x6   :  { %531 = shalt.err (!%p528_p2)
}
   0x7   :  { %s532_s21 = scalar_lea.vmem %s17_s13, 3072  ;;  %p537_p4 = scmp.lt.s32.totalorder %s17_s13, %s17_s13 }
   0x8   :  { %p533_p3 = scmp.ne.s32.totalorder %s17_s13, %s532_s21  ;;  %p538_p5 = scmp.lt.s32.totalorder %s532_s21, %s532_s21 }
   0xa   :  { %p539_p6 = por %p538_p5, %p537_p4 }
   0xc   :  { %p540_p7 = pnand %p539_p6, %p533_p3 }
   0xe   :  { %543 = shalt.err (!%p540_p7)
}
   0xf   :  { %s547_s22 = smov 64   ;;  %s548_s23 = smov 4  }
  0x10   :  { %22 = dma.hbm_to_vmem [thread:$0]  %s629_s1, 3072, %s17_s13, [#allocation3], %s547_s22, %s547_s22, %s548_s23  }
  0x11   :  { %544 = dma.done.wait [#allocation3], 3072  }
  0x12   :  { %545 = vsyncadd [#allocation3], 4294964224  ;;  %v549_v0 = vmov 0.0   ;;  %vm550_vm0 = vmmov 0   ;;  %v498_v1 = vld [vmem:[#allocation2] sm:$0xff]   ;;  %v499_v2 = vld [vmem:[#allocation2 + $0x8] sm:$0xff]  }
  0x13   :  { %433 = vmatprep.subr.bf16.mxu0 %v549_v0  ;;  %449 = vmatprep.mubr.msk.bf16.mxu0 %vm550_vm0, %v549_v0  ;;  %v500_v3 = vld [vmem:[#allocation2 + $0x10] sm:$0xff]   ;;  %v506_v4 = vld [vmem:[#allocation2 + $0x40] sm:$0xff]   ;;  %v501_v5 = vld [vmem:[#allocation2 + $0x18] sm:$0xff]  }
  0x14   :  { %453 = vmatprep.subr.bf16.mxu1 %v549_v0  ;;  %469 = vmatprep.mubr.msk.bf16.mxu1 %vm550_vm0, %v549_v0  ;;  %v507_v6 = vld [vmem:[#allocation2 + $0x48] sm:$0xff]   ;;  %v502_v7 = vld [vmem:[#allocation2 + $0x20] sm:$0xff]   ;;  %v508_v8 = vld [vmem:[#allocation2 + $0x50] sm:$0xff]  }
  0x15   :  { %434 = vmatpush3.bf16.msra.mxu0 %v498_v1  ;;  %454 = vmatpush3.bf16.msra.mxu1 %v506_v4  ;;  %v503_v9 = vld [vmem:[#allocation2 + $0x28] sm:$0xff]   ;;  %v509_v10 = vld [vmem:[#allocation2 + $0x58] sm:$0xff]   ;;  %v504_v11 = vld [vmem:[#allocation2 + $0x30] sm:$0xff]  }
  0x16   :  { %435 = vmatprep.subr.bf16.mxu0 %v549_v0  ;;  %455 = vmatprep.subr.bf16.mxu1 %v549_v0  ;;  %v510_v12 = vld [vmem:[#allocation2 + $0x60] sm:$0xff]   ;;  %v505_v13 = vld [vmem:[#allocation2 + $0x38] sm:$0xff]   ;;  %v511_v14 = vld [vmem:[#allocation2 + $0x68] sm:$0xff]  }
  0x17   :  { %v29_v15 = vld [vmem:[%s628_s0] sm:$0xf]  ;;  %v512_v16 = vld [vmem:[#allocation2 + $0x70] sm:$0xff]   ;;  %v513_v17 = vld [vmem:[#allocation2 + $0x78] sm:$0xff]  }
  0x18   :  { %v514_v18 = vld [vmem:[#allocation2 + $0x80] sm:$0xff]   ;;  %v515_v19 = vld [vmem:[#allocation2 + $0x88] sm:$0xff]   ;;  %v516_v20 = vld [vmem:[#allocation2 + $0x90] sm:$0xff]  }
  0x19   :  { %436 = vmatpush3.bf16.msra.mxu0 %v499_v2  ;;  %456 = vmatpush3.bf16.msra.mxu1 %v507_v6  ;;  %v517_v21 = vld [vmem:[#allocation2 + $0x98] sm:$0xff]   ;;  %v518_v22 = vld [vmem:[#allocation2 + $0xa0] sm:$0xff]   ;;  %v519_v23 = vld [vmem:[#allocation2 + $0xa8] sm:$0xff]  }
  0x1a   :  { %437 = vmatprep.subr.bf16.mxu0 %v549_v0  ;;  %457 = vmatprep.subr.bf16.mxu1 %v549_v0  ;;  %v377_v24 = vld [vmem:[%s630_s2] ss:$0 sm:$0xff]  ;;  %v520_v32 = vld [vmem:[#allocation2 + $0xb0] sm:$0xff]   ;;  %v521_v33 = vld [vmem:[#allocation2 + $0xb8] sm:$0xff]  }
  0x1b   :  { %v387_v34 = vld [vmem:[%s630_s2 + $0x1] ss:$0 sm:$0xff]  ;;  %v397_v42 = vld [vmem:[%s630_s2 + $0x2] ss:$0 sm:$0xff] }
  0x1d   :  { %438 = vmatpush3.bf16.msra.mxu0 %v500_v3  ;;  %458 = vmatpush3.bf16.msra.mxu1 %v508_v8 }
  0x1e   :  { %439 = vmatprep.subr.bf16.mxu0 %v549_v0  ;;  %459 = vmatprep.subr.bf16.mxu1 %v549_v0 }
  0x21   :  { %440 = vmatpush3.bf16.msra.mxu0 %v501_v5  ;;  %460 = vmatpush3.bf16.msra.mxu1 %v509_v10 }
  0x22   :  { %441 = vmatprep.subr.bf16.mxu0 %v549_v0  ;;  %461 = vmatprep.subr.bf16.mxu1 %v549_v0 }
  0x25   :  { %442 = vmatpush3.bf16.msra.mxu0 %v502_v7  ;;  %462 = vmatpush3.bf16.msra.mxu1 %v510_v12 }
  0x26   :  { %443 = vmatprep.subr.bf16.mxu0 %v549_v0  ;;  %463 = vmatprep.subr.bf16.mxu1 %v549_v0 }
  0x29   :  { %444 = vmatpush3.bf16.msra.mxu0 %v503_v9  ;;  %464 = vmatpush3.bf16.msra.mxu1 %v511_v14 }
  0x2a   :  { %445 = vmatprep.subr.bf16.mxu0 %v549_v0  ;;  %465 = vmatprep.subr.bf16.mxu1 %v549_v0 }
  0x2d   :  { %446 = vmatpush3.bf16.msra.mxu0 %v504_v11  ;;  %466 = vmatpush3.bf16.msra.mxu1 %v512_v16 }
  0x2e   :  { %447 = vmatprep.subr.bf16.mxu0 %v549_v0  ;;  %467 = vmatprep.subr.bf16.mxu1 %v549_v0 }
  0x31   :  { %448 = vmatpush3.bf16.msra.mxu0 %v505_v13  ;;  %468 = vmatpush3.bf16.msra.mxu1 %v513_v17 }
  0x32   :  { %473 = vmatprep.subr.bf16.mxu0 %v549_v0 }
  0x34   :  { %450 = vmatmul.mubr.bf16.vlgmr.msra.gmra.mrb[0].mxu0 %v29_v15 }
  0x35   :  { %489 = vmatprep.mubr.msk.bf16.mxu0 %vm550_vm0, %v549_v0  ;;  %474 = vmatpush3.bf16.msra.mxu0 %v514_v18 }
  0x36   :  { %475 = vmatprep.subr.bf16.mxu0 %v549_v0 }
  0x39   :  { %476 = vmatpush3.bf16.msra.mxu0 %v515_v19 }
  0x3a   :  { %477 = vmatprep.subr.bf16.mxu0 %v549_v0 }
  0x3d   :  { %478 = vmatpush3.bf16.msra.mxu0 %v516_v20 }
  0x3e   :  { %479 = vmatprep.subr.bf16.mxu0 %v549_v0 }
  0x41   :  { %480 = vmatpush3.bf16.msra.mxu0 %v517_v21 }
  0x42   :  { %481 = vmatprep.subr.bf16.mxu0 %v549_v0 }
  0x45   :  { %482 = vmatpush3.bf16.msra.mxu0 %v518_v22 }
  0x46   :  { %483 = vmatprep.subr.bf16.mxu0 %v549_v0 }
  0x49   :  { %484 = vmatpush3.bf16.msra.mxu0 %v519_v23 }
  0x4a   :  { %485 = vmatprep.subr.bf16.mxu0 %v549_v0 }
  0x4d   :  { %486 = vmatpush3.bf16.msra.mxu0 %v520_v32 }
  0x4e   :  { %487 = vmatprep.subr.bf16.mxu0 %v549_v0 }
  0x51   :  { %488 = vmatpush3.bf16.msra.mxu0 %v521_v33 }
 0x107   :  { %v135_v25 = vpop.f32.mrb[0].mxu0 }
 0x108   :  { %v136_v26 = vadd.f32 %v377_v24, %v135_v25  ;;  %v451_v27 = vpop.f32.mrb[1].mxu0 }
 0x109   :  { %v138_v28 = vpop.f32.mrb[2].mxu0 }
 0x10a   :  { %v141_v29 = vmax.f32 %v136_v26, 0.0  ;;  %v452_v30 = vpop.f32.mrb[3].mxu0 }
 0x10c   :  { %v142_v31 = vpack.c.bf16 %v141_v29, %v141_v29 }
 0x10e   :  { %470 = vmatmul.mubr.bf16.vlgmr.msra.gmra.mrb[0].mxu1 %v142_v31 }
 0x1e1   :  { %v250_v35 = vpop.f32.mrb[0].mxu1 }
 0x1e2   :  { %v251_v36 = vadd.f32 %v387_v34, %v250_v35  ;;  %v471_v37 = vpop.f32.mrb[1].mxu1 }
 0x1e3   :  { %v253_v38 = vpop.f32.mrb[2].mxu1 }
 0x1e4   :  { %v256_v39 = vmax.f32 %v251_v36, 0.0  ;;  %v472_v40 = vpop.f32.mrb[3].mxu1 }
 0x1e6   :  { %v257_v41 = vpack.c.bf16 %v256_v39, %v256_v39 }
 0x1e8   :  { %490 = vmatmul.mubr.bf16.vlgmr.msra.gmra.mrb[4].mxu0 %v257_v41 }
 0x2bb   :  { %v365_v43 = vpop.f32.mrb[4].mxu0 }
 0x2bc   :  { %v366_v44 = vadd.f32 %v397_v42, %v365_v43  ;;  %v491_v45 = vpop.f32.mrb[5].mxu0 }
 0x2bd   :  { %v368_v46 = vpop.f32.mrb[6].mxu0 }
 0x2be   :  { %371 = vst [vmem:[%s631_s3] sm:$0xff] %v366_v44  ;;  %v492_v47 = vpop.f32.mrb[7].mxu0 }
 0x2bf   :  { %376 = vsyncpa [#allocation3], 1 }

</bundles_post_ra>
